<compile_context>
chip_gen: v7x
topology: tpu7x:2x2x1
jax: 0.10.0
libtpu: 0.0.40
codegen_flags: <defaults>
</compile_context>

<pallas_src>
import functools

import numpy as np
import jax
import jax.numpy as jnp
from jax.experimental import pallas as pl
from jax.experimental.pallas import tpu as pltpu


# --------------------------- pass 1: row min/max ---------------------------
def _minmax_kernel(x_ref, min_ref, max_ref, *, f_total, f_tile):
    """Per-row min/max. Grid = (row tiles ["parallel"], F tiles ["arbitrary"])."""
    j = pl.program_id(1)
    x = x_ref[...]                       # reduce in the input dtype (no full-tile upcast)

    def _accum(tile_min, tile_max):
        @pl.when(j == 0)
        def _():
            min_ref[...] = tile_min
            max_ref[...] = tile_max

        @pl.when(j != 0)
        def _():
            min_ref[...] = jnp.minimum(min_ref[...], tile_min)
            max_ref[...] = jnp.maximum(max_ref[...], tile_max)

    if f_total % f_tile == 0:
        # Lane-aligned tiling: every tile is pure min/max.
        _accum(jnp.min(x, axis=-1, keepdims=True).astype(jnp.float32),
               jnp.max(x, axis=-1, keepdims=True).astype(jnp.float32))
    else:
        last = pl.num_programs(1) - 1

        @pl.when(j != last)                     # full tiles: no masking work at all
        def _():
            _accum(jnp.min(x, axis=-1, keepdims=True).astype(jnp.float32),
                   jnp.max(x, axis=-1, keepdims=True).astype(jnp.float32))

        @pl.when(j == last)                     # ragged last tile only: mask OOB lanes
        def _():
            col = jax.lax.broadcasted_iota(jnp.int32, x.shape, 1) + j * f_tile
            valid = col < f_total
            big = jnp.asarray(jnp.finfo(x.dtype).max, dtype=x.dtype)
            x_for_min = jnp.where(valid, x, big)
            x_for_max = jnp.where(valid, x, -big)
            _accum(jnp.min(x_for_min, axis=-1, keepdims=True).astype(jnp.float32),
                   jnp.max(x_for_max, axis=-1, keepdims=True).astype(jnp.float32))


# ----------------------------- pass 2: quantize -----------------------------
def _quantize_kernel(clip_ref, inv_scale_ref, add_ref, scale_ref, bias_ref, x_ref, q_ref):
    """Unified signed/unsigned fake-quantization of one (TN, TF) tile.

    clip_ref (SMEM): [clip_max] = 254 (signed) or 255 (unsigned)
    per-row (TN,1): inv_scale, add = zp*inv_scale, scale, bias = offset*scale
    """
    clip_max = clip_ref[0]
    x = x_ref[...].astype(jnp.float32)
    y = jnp.clip(x * inv_scale_ref[...] + add_ref[...], 0.0, clip_max)
    q_ref[...] = (jnp.round(y) * scale_ref[...] - bias_ref[...]).astype(q_ref.dtype)


# ------------------------------ tiling heuristics ----------------------------
def _choose_sublane_fold(n, f):
    """Fold part of F into the row axis so blocks are sublane-dense when N is small
    or not a multiple of 8 (e.g. N=2 -> view each row as 8 sub-rows of F/8)."""
    if n % 8 == 0:
        return 1
    for s in (8, 4, 2):
        if f % s == 0 and (n * s) % 8 == 0 and (f // s) >= 128:
            return s
    return 1


def _choose_row_tile(ns, row_cap=256):
    """Row-tile size: a multiple-of-8 divisor of ns, capped, and giving >=2 row tiles
    when possible so pass 1 has a 'parallel' axis for the v7x megacore."""
    if ns % 8 != 0 or ns <= 8:
        return int(ns)                       # full extent (legal as a block dim)
    limit = max(8, min(row_cap, ns // 2))
    best, cand = 8, 8
    while cand <= limit:
        if ns % cand == 0:
            best = cand
        cand += 8
    return int(best)


def _choose_f_tile(tn, fs, max_f_tile=None, target_bytes=4 * 1024 * 1024):
    """Lane tile: ~target_bytes per f32 (tn, TF) buffer; prefer a multiple-of-128
    divisor of fs so no ragged last tile; fall back to a ragged multiple of 128."""
    cap = max(128, (target_bytes // (4 * max(tn, 1))) // 128 * 128)
    if max_f_tile is not None:
        cap = min(cap, max(128, (max_f_tile // 128) * 128))
    if fs <= cap:
        return int(fs)                       # whole F extent in one block
    d = cap
    while d >= 128:
        if fs % d == 0:
            return int(d)                    # exact divisor -> no masking anywhere
        d -= 128
    return int(cap)                          # ragged; kernel masks last tile only


# --------------------------------- wrapper ----------------------------------
def quant_measure_forward(x, running_range, running_zero_point,
                          num_bits=8, momentum=0.1, max_f_tile=None):
    """Returns (q, new_running_range, new_running_zero_point, aux)."""
    orig_shape = x.shape
    N = int(orig_shape[0])
    F = int(np.prod(orig_shape[1:]))

    # Sublane folding: (N, F) -> (N*S, F//S), row-major, so each original row becomes
    # S consecutive sub-rows (min/max combine exactly; qparams replicate per sub-row).
    S = _choose_sublane_fold(N, F)
    NS, FS = N * S, F // S
    x2 = x.reshape(NS, FS)                   # keep original dtype (no HBM upcast)

    TN = _choose_row_tile(NS)
    TF = _choose_f_tile(TN, FS, max_f_tile)
    n_row_tiles = NS // TN
    n_f_tiles = pl.cdiv(FS, TF)
    vmem_limit = 48 * 1024 * 1024

    # ---- pass 1: per-sub-row min / max (resident (TN,1) accumulators per row tile) ----
    row_min, row_max = pl.pallas_call(
        functools.partial(_minmax_kernel, f_total=FS, f_tile=TF),
        grid=(n_row_tiles, n_f_tiles),
        in_specs=[pl.BlockSpec((TN, TF), lambda i, j: (i, j))],
        out_specs=(pl.BlockSpec((TN, 1), lambda i, j: (i, 0)),
                   pl.BlockSpec((TN, 1), lambda i, j: (i, 0))),
        out_shape=(jax.ShapeDtypeStruct((NS, 1), jnp.float32),
                   jax.ShapeDtypeStruct((NS, 1), jnp.float32)),
        compiler_params=pltpu.CompilerParams(
            dimension_semantics=("parallel", "arbitrary"),
            vmem_limit_bytes=vmem_limit),
    )(x2)

    # ---- glue (tiny (N,1)-sized XLA ops): fold the data-dependent signed/unsigned
    #      branch into pre-fused per-row quantization params. The branch needs the
    #      GLOBAL min, so it cannot live inside a row-parallel pass-1 epilogue. ----
    rmin = row_min.reshape(N, S).min(axis=1, keepdims=True)        # (N, 1) per-sample
    rmax = row_max.reshape(N, S).max(axis=1, keepdims=True)
    g_min = jnp.min(rmin)
    signed = g_min < 0.0                                           # data dependent

    absmax_row = jnp.maximum(jnp.abs(rmax), jnp.abs(rmin))         # (N, 1)
    abs_g = jnp.max(absmax_row)                                    # scalar

    qmax_s = 2.0 ** (num_bits - 1) - 1.0      # 127
    qmax_u = 2.0 ** num_bits - 1.0            # 255

    # signed: scale = 2*absmax/254 == absmax/127 ; unsigned: abs_g/255
    scale_row = jnp.where(signed, absmax_row / qmax_s, abs_g / qmax_u).astype(jnp.float32)
    zp_row = jnp.where(signed, absmax_row, 0.0).astype(jnp.float32)
    inv_row = (1.0 / scale_row).astype(jnp.float32)                # exact f32 reciprocal
    offset = jnp.where(signed, qmax_s, 0.0).astype(jnp.float32)
    add_row = (zp_row * inv_row).astype(jnp.float32)               # pre-fused zp/scale
    bias_row = (offset * scale_row).astype(jnp.float32)
    clip_max = jnp.where(signed, 2.0 * qmax_s, qmax_u).astype(jnp.float32).reshape(1)

    def _rep(a):   # replicate per-sample params to the S folded sub-rows
        return jnp.repeat(a, S, axis=0) if S > 1 else a

    inv_scale = _rep(inv_row)
    add = _rep(add_row)
    scale = _rep(scale_row)
    bias = _rep(bias_row)

    # ---- pass 2: quantize (independent tiles -> fully "parallel" for the megacore) ----
    q2 = pl.pallas_call(
        _quantize_kernel,
        grid=(n_row_tiles, n_f_tiles),
        in_specs=[pl.BlockSpec(memory_space=pltpu.MemorySpace.SMEM),    # clip_max
                  pl.BlockSpec((TN, 1), lambda i, j: (i, 0)),           # inv_scale
                  pl.BlockSpec((TN, 1), lambda i, j: (i, 0)),           # add
                  pl.BlockSpec((TN, 1), lambda i, j: (i, 0)),           # scale
                  pl.BlockSpec((TN, 1), lambda i, j: (i, 0)),           # bias
                  pl.BlockSpec((TN, TF), lambda i, j: (i, j))],         # x
        out_specs=pl.BlockSpec((TN, TF), lambda i, j: (i, j)),
        out_shape=jax.ShapeDtypeStruct((NS, FS), x2.dtype),
        compiler_params=pltpu.CompilerParams(
            dimension_semantics=("parallel", "parallel"),
            vmem_limit_bytes=vmem_limit),
    )(clip_max, inv_scale, add, scale, bias, x2)

    q = q2.reshape(orig_shape)

    # ---- running-buffer EMA (matches PyTorch exactly for the scalar/unsigned path).
    # TODO(synk): per-sample (signed-path) running-buffer update is shape-mismatched in
    # PyTorch itself; we use the global-scalar equivalent in that case.
    scalar_range = jnp.where(signed, 2.0 * abs_g, abs_g)
    scalar_zp = abs_g
    new_rr = running_range * momentum + scalar_range * (1.0 - momentum)
    new_rzp = running_zero_point * momentum + scalar_zp * (1.0 - momentum)

    aux = dict(signed=signed,
               range=jnp.where(signed, 2.0 * absmax_row, abs_g),
               zero_point=jnp.where(signed, absmax_row, abs_g),
               scale=scale_row, inv_scale=inv_row,
               clip_max=clip_max, offset=offset,
               tiling=dict(S=S, TN=TN, TF=TF, grid=(n_row_tiles, n_f_tiles)))
    return q, new_rr, new_rzp, aux


# ---------------- pure-numpy reference (mirrors the PyTorch code) ----------------
def _ref_quant_measure(x, num_bits=8):
    """PyTorch-faithful reference using the same fused formulation as the kernel
    (x*inv + add, round*scale - bias); differs from a literal divide by at most one
    quantization step at exact .5 rounding boundaries."""
    x = np.asarray(x, dtype=np.float32)
    N = x.shape[0]
    xf = x.reshape(N, -1)
    row_min = xf.min(axis=1).astype(np.float32)
    row_max = xf.max(axis=1).astype(np.float32)
    if xf.min() < 0:                      # signed path: per-sample qparams
        absmax = np.maximum(np.abs(row_max), np.abs(row_min)).astype(np.float32)
        absmax_b = absmax.reshape((N,) + (1,) * (x.ndim - 1))
        qmax = np.float32(2.0 ** (num_bits - 1) - 1.0)             # 127
        scale = (absmax_b / qmax).astype(np.float32)
        inv = (np.float32(1.0) / scale).astype(np.float32)
        add = (absmax_b * inv).astype(np.float32)
        bias = (qmax * scale).astype(np.float32)
        y = np.clip((x * inv + add).astype(np.float32), 0.0, 2.0 * float(qmax))
        q = np.round(y).astype(np.float32) * scale - bias
        return q.astype(np.float32), 2.0 * absmax_b, absmax_b, scale, True
    else:                                 # unsigned path: scalar qparams
        gmin = np.float32(row_min.min())
        gmax = np.float32(row_max.max())
        abs_g = np.float32(max(abs(float(gmax)), abs(float(gmin))))
        qmax = np.float32(2.0 ** num_bits - 1.0)                   # 255
        scale = np.float32(abs_g / qmax)
        inv = np.float32(1.0) / scale
        q = np.round(np.clip((x * inv).astype(np.float32), 0.0, float(qmax))
                     ).astype(np.float32) * scale
        return q.astype(np.float32), abs_g, abs_g, scale, False


def _check(q_kernel, q_ref, scale_ref):
    """Quantization-step-aware comparison (robust to 1-ulp scale differences)."""
    q_kernel = np.asarray(q_kernel, dtype=np.float32)
    step = float(np.max(np.abs(scale_ref)))
    np.testing.assert_allclose(q_kernel, q_ref, rtol=0.0, atol=step + 1e-5)
    # and (near-)bit-exact almost everywhere
    assert np.mean(np.abs(q_kernel - q_ref) > 1e-4) < 0.01


if __name__ == "__main__":
    key = jax.random.PRNGKey(0)
    k1, k2, k3, k4 = jax.random.split(key, 4)

    # Buffers (shape_measure=(1,)), deterministic init.
    running_range = jnp.zeros((1,), jnp.float32)
    running_zero_point = jnp.zeros((1,), jnp.float32)

    # Case 1: non-negative input (post-ReLU) -> unsigned scalar qparams.
    # N=2 triggers sublane folding (S=8 -> 16x128 slab) and two row tiles, so the
    # pass-1 "parallel" axis is exercised.
    x_pos = jnp.abs(jax.random.normal(k1, (2, 4, 16, 16), dtype=jnp.float32))
    q_pos, new_rr, new_rzp, aux_pos = quant_measure_forward(
        x_pos, running_range, running_zero_point)
    jax.block_until_ready((q_pos, new_rr, new_rzp))
    q_ref, rng_ref, zp_ref, scale_ref, signed_ref = _ref_quant_measure(np.asarray(x_pos))
    assert not signed_ref
    _check(q_pos, q_ref, scale_ref)
    np.testing.assert_allclose(np.asarray(new_rr),
                               np.zeros(1) * 0.1 + rng_ref * 0.9, rtol=1e-5, atol=1e-6)
    np.testing.assert_allclose(np.asarray(new_rzp),
                               np.zeros(1) * 0.1 + zp_ref * 0.9, rtol=1e-5, atol=1e-6)

    # Case 2: signed input -> per-sample qparams, signed path.
    x_sgn = jax.random.normal(k2, (2, 4, 16, 16), dtype=jnp.float32)
    q_sgn, _, _, aux_sgn = quant_measure_forward(x_sgn, running_range, running_zero_point)
    jax.block_until_ready(q_sgn)
    q_ref2, _, _, scale_ref2, signed_ref2 = _ref_quant_measure(np.asarray(x_sgn))
    assert signed_ref2
    _check(q_sgn, q_ref2, scale_ref2)

    # Case 3: F=960 with max_f_tile=256 -> 4 F tiles, ragged (pl.when-gated masked)
    # last tile, multi-tile min/max accumulation; N=8 so no folding.
    x_rag = jax.random.normal(k3, (8, 6, 10, 16), dtype=jnp.float32)
    q_rag, _, _, aux_rag = quant_measure_forward(
        x_rag, running_range, running_zero_point, max_f_tile=256)
    jax.block_until_ready(q_rag)
    q_ref3, _, _, scale_ref3, signed_ref3 = _ref_quant_measure(np.asarray(x_rag))
    assert signed_ref3
    _check(q_rag, q_ref3, scale_ref3)

    # Case 4: bf16 input -> pass 1 reduces in bf16, output stays bf16 (loose check:
    # only the final bf16 rounding of q differs from the f32 reference).
    x_bf = jnp.abs(jax.random.normal(k4, (2, 4, 16, 16), dtype=jnp.float32)
                   ).astype(jnp.bfloat16)
    q_bf, _, _, _ = quant_measure_forward(x_bf, running_range, running_zero_point)
    jax.block_until_ready(q_bf)
    q_ref4, _, _, scale_ref4, signed_ref4 = _ref_quant_measure(
        np.asarray(x_bf, dtype=np.float32))
    assert not signed_ref4
    qb = np.asarray(q_bf, dtype=np.float32)
    atol_bf = max(float(np.max(np.abs(q_ref4))) * 2.0 ** -8 + 1e-6, float(scale_ref4))
    np.testing.assert_allclose(qb, q_ref4, rtol=0.0, atol=atol_bf)

    print("KERNEL_OK")
</pallas_src>

<mosaic_0001>
module attributes {stable_mosaic.version = 11 : i64} {
  func.func @_minmax_kernel(%arg0: i32, %arg1: i32, %arg2: memref<8x128xf32, #tpu.memory_space<vmem>>, %arg3: memref<8x1xf32, #tpu.memory_space<vmem>>, %arg4: memref<8x1xf32, #tpu.memory_space<vmem>>) attributes {dimension_semantics = [#tpu.dimension_semantics<parallel>, #tpu.dimension_semantics<arbitrary>], iteration_bounds = array<i64: 2, 1>, scalar_prefetch = 0 : i64, scratch_operands = 0 : i64, tpu.core_type = #tpu.core_type<tc>, window_params = [{transform_indices = @transform_0, window_bounds = array<i64: 8, 128>}, {transform_indices = @transform_1, window_bounds = array<i64: 8, 1>}, {transform_indices = @transform_2, window_bounds = array<i64: 8, 1>}]} {
    %c0 = arith.constant 0 : index
    %c0_0 = arith.constant 0 : index
    %0 = vector.load %arg2[%c0, %c0_0] : memref<8x128xf32, #tpu.memory_space<vmem>>, vector<8x128xf32>
    %cst = arith.constant dense<0x7F800000> : vector<8xf32>
    %1 = vector.multi_reduction <minimumf>, %0, %cst [1] : vector<8x128xf32> to vector<8xf32>
    %2 = vector.shape_cast %1 : vector<8xf32> to vector<8x1xf32>
    %cst_1 = arith.constant dense<0xFF800000> : vector<8xf32>
    %3 = vector.multi_reduction <maximumf>, %0, %cst_1 [1] : vector<8x128xf32> to vector<8xf32>
    %4 = vector.shape_cast %3 : vector<8xf32> to vector<8x1xf32>
    %c0_i32 = arith.constant 0 : i32
    %5 = arith.cmpi eq, %arg1, %c0_i32 : i32
    %6 = arith.extui %5 : i1 to i32
    %c0_i32_2 = arith.constant 0 : i32
    %7 = arith.cmpi ne, %6, %c0_i32_2 : i32
    scf.if %7 {
      %c0_5 = arith.constant 0 : index
      %c0_6 = arith.constant 0 : index
      %11 = vector.load %arg3[%c0_5, %c0_6] : memref<8x1xf32, #tpu.memory_space<vmem>>, vector<8x1xf32>
      tpu.vector_store %arg3[%c0_5, %c0_6], %2 {strides = array<i32>} : memref<8x1xf32, #tpu.memory_space<vmem>>, vector<8x1xf32>,
      %c0_7 = arith.constant 0 : index
      %c0_8 = arith.constant 0 : index
      %12 = vector.load %arg4[%c0_7, %c0_8] : memref<8x1xf32, #tpu.memory_space<vmem>>, vector<8x1xf32>
      tpu.vector_store %arg4[%c0_7, %c0_8], %4 {strides = array<i32>} : memref<8x1xf32, #tpu.memory_space<vmem>>, vector<8x1xf32>,
    } else {
    }
    %c0_i32_3 = arith.constant 0 : i32
    %8 = arith.cmpi ne, %arg1, %c0_i32_3 : i32
    %9 = arith.extui %8 : i1 to i32
    %c0_i32_4 = arith.constant 0 : i32
    %10 = arith.cmpi ne, %9, %c0_i32_4 : i32
    scf.if %10 {
      %c0_5 = arith.constant 0 : index
      %c0_6 = arith.constant 0 : index
      %11 = vector.load %arg3[%c0_5, %c0_6] : memref<8x1xf32, #tpu.memory_space<vmem>>, vector<8x1xf32>
      %12 = arith.minimumf %11, %2 : vector<8x1xf32>
      %c0_7 = arith.constant 0 : index
      %c0_8 = arith.constant 0 : index
      %13 = vector.load %arg3[%c0_7, %c0_8] : memref<8x1xf32, #tpu.memory_space<vmem>>, vector<8x1xf32>
      tpu.vector_store %arg3[%c0_7, %c0_8], %12 {strides = array<i32>} : memref<8x1xf32, #tpu.memory_space<vmem>>, vector<8x1xf32>,
      %c0_9 = arith.constant 0 : index
      %c0_10 = arith.constant 0 : index
      %14 = vector.load %arg4[%c0_9, %c0_10] : memref<8x1xf32, #tpu.memory_space<vmem>>, vector<8x1xf32>
      %15 = arith.maximumf %14, %4 : vector<8x1xf32>
      %c0_11 = arith.constant 0 : index
      %c0_12 = arith.constant 0 : index
      %16 = vector.load %arg4[%c0_11, %c0_12] : memref<8x1xf32, #tpu.memory_space<vmem>>, vector<8x1xf32>
      tpu.vector_store %arg4[%c0_11, %c0_12], %15 {strides = array<i32>} : memref<8x1xf32, #tpu.memory_space<vmem>>, vector<8x1xf32>,
    } else {
    }
    return
  }
  func.func @transform_0(%arg0: i32, %arg1: i32) -> (i32, i32) {
    %c0_i32 = arith.constant 0 : i32
    return %arg0, %arg1 : i32, i32
  }
  func.func @transform_1(%arg0: i32, %arg1: i32) -> (i32, i32) {
    %c0_i32 = arith.constant 0 : i32
    %c0_i32_0 = arith.constant 0 : i32
    return %arg0, %c0_i32 : i32, i32
  }
  func.func @transform_2(%arg0: i32, %arg1: i32) -> (i32, i32) {
    %c0_i32 = arith.constant 0 : i32
    %c0_i32_0 = arith.constant 0 : i32
    return %arg0, %c0_i32 : i32, i32
  }
}

</mosaic_0001>

<bundles_post_ra>
// kernel: tpu_custom_call.1
= control target key start
LH: loop header
LB: loop body
LE: loop exit
PB: predicated region body
PF: predicated region fallthrough
CT: control target
= control target key end

     0   :  { %8 = vsyncpa [#allocation3], 0  ;;  %s606_s0 = inlined_call_operand.hbm [shape: f32[16,128], index: 0, kind: input, shape index: {}]   ;;  %s607_s1 = inlined_call_operand.vmem [shape: f32[16,1], index: 1, kind: output, shape index: {0}]   ;;  %s608_s2 = inlined_call_operand.vmem [shape: f32[16,1], index: 2, kind: output, shape index: {1}]  }
   0x1   :  { %10 = vsyncpa [#allocation3 + $0x1], 0  ;;  %s478_s9 = smov 0   ;;  %s480_s10 = smov 0  }
   0x2   :  { %s482_s11 = smov 0   ;;  %s484_s12 = smov 0  }
   0x3   :  { %s486_s13 = smov 0   ;;  %s488_s14 = smov 0  }
   0x4 LB: > { %s313_s15 = sadd.s32 4294967295, %s460_s14   ;;  %s28_s16 = sadd.s32 1, %s456_s13  ;;  %s460_s14 = sphi %s488_s14, %s16_s14   ;;  %s456_s13 = sphi %s486_s13, %s618_s13   ;;  %s452_s12 = sphi %s484_s12, %s617_s12   ;;  %s448_s11 = sphi %s482_s11, %s616_s11   ;;  %s444_s10 = sphi %s480_s10, %s615_s10   ;;  %s440_s9 = sphi %s478_s9, %s614_s9  }
   0x5   : > { %p30_p0 = scmp.ge.s32.totalorder %s28_s16, 2  ;;  %s37_s17 = sadd.s32 1, %s448_s11 }
   0x6   : > { %p44_p1 = scmp.ne.s32.totalorder %s448_s11, %s444_s10  ;;  %p45_p2 = scmp.eq.s32.totalorder %s460_s14, 0 }
   0x7   : > { %s620_s16 = smov (%p30_p0, %s28_s16), 0  ;;  %p50_p4 = scmp.ne.s32.totalorder %s444_s10, %s440_s9 }
   0x8   : > { %p514_p3 = por %p45_p2, %p44_p1  ;;  %s32_s19 = ssub.s32 %s456_s13, %s620_s16 }
   0x9   : > { %p51_p5 = scmp.eq.s32.totalorder %s313_s15, 0  ;;  %p35_p6 = scmp.eq.s32.totalorder %s32_s19, 0 }
   0xa   : > { %p331_p8 = scmp.lt.s32.totalorder %s460_s14, 2  ;;  %s126_s22 = sand.u32 1, %s448_s11  }
   0xb   : > { %p521_p7 = por %p51_p5, %p50_p4  ;;  %s318_s23 = sshll.u32 %s456_s13, 7 }
   0xc   : > { %s527_s21 = scalar_select %p35_p6, %s448_s11, %s37_s17  }
   0xd   : > { %s317_s24 = sshll.u32 %s126_s22, 3  ;;  %s534_s27 = scalar_lea.hbm %s606_s0, %s318_s23 }
   0xe   : > { %s130_s28 = scalar_lea.vmem [#allocation2], %s317_s24  ;;  %p538_p9 = pnand %p331_p8, %p514_p3 }
   0xf   : > { %s138_s29 = sshll.u32 %s130_s28, 4  ;;  %s127_s3 = scalar_lea.sflag [#allocation3], %s126_s22  ;;  %s542_s29 = int_to_ptr.vmem [resolvable:$true] %s138_s29 }
  0x10   : > { %s380_s4 = scalar_lea.hbm %s534_s27, 128  ;;  %p382_p13 = pneg %p538_p9 }
  0x11   : > { %p381_p12 = scmp.ne.s32.totalorder %s534_s27, %s380_s4  ;;  %s385_s7 = scalar_lea.hbm %s606_s0, 256 }
  0x12   : > { %p386_p2 = scmp.lt.u32.totalorder %s534_s27, %s606_s0  ;;  %p387_p3 = scmp.lt.u32.totalorder %s385_s7, %s380_s4 }
  0x13   : > { %p383_p0 = pnand %p382_p13, %p381_p12  ;;  %p389_p5 = scmp.lt.u32.totalorder %s380_s4, %s534_s27 }
  0x14   : > { %p388_p4 = por %p387_p3, %p386_p2 }
  0x15   : > { %p384_p1 = pneg %p383_p0 }
  0x16   : > { %p390_p6 = por %p389_p5, %p388_p4 }
  0x18   : > { %p391_p8 = pnand %p390_p6, %p384_p1 }
  0x1a   : > { %394 = shalt.err (!%p391_p8)
}
  0x1b   : > { %s395_s15 = scalar_lea.vmem %s542_s29, 128  ;;  %s462_s17 = smov [#allocation2]  }
  0x1c   : > { %p396_p12 = scmp.ne.s32.totalorder %s542_s29, %s395_s15  ;;  %s400_s18 = sshll.u32 %s462_s17, 4  ;;  %s401_s18 = int_to_ptr.vmem [resolvable:$false] %s400_s18 }
  0x1d   : > { %s402_s19 = scalar_lea.vmem %s401_s18, 256  ;;  %p403_p11 = scmp.lt.s32.totalorder %s542_s29, %s401_s18 }
  0x1e   : > { %p398_p0 = pnand %p396_p12, %p382_p13  ;;  %p404_p2 = scmp.lt.s32.totalorder %s402_s19, %s395_s15 }
  0x20   : > { %p399_p10 = pneg %p398_p0  ;;  %p405_p3 = por %p404_p2, %p403_p11 }
  0x22   : > { %p406_p4 = pnand %p405_p3, %p399_p10 }
  0x24   : > { %409 = shalt.err (!%p406_p4)
}
  0x25   : > { %330 = dma.hbm_to_vmem [thread:$0]  (!%p538_p9), %s534_s27, 128, %s542_s29, %s127_s3  }
  0x26   : > { %p612_p1 = scmp.lt.s32.totalorder %s460_s14, 3  ;;  %p613_p5 = scmp.ge.s32.totalorder %s460_s14, 1 }
  0x28   : > { %p144_p13 = pnand %p613_p5, %p612_p1 }
  0x29   : > { %s149_s22 = sand.u32 (!%p144_p13), 1, %s444_s10  }
  0x2a   : > { %147 = sbr.rel (%p144_p13) target bundleno = 198 (0xc6), region = 24  ;;  %s320_s23 = sshll.u32 (!%p144_p13), %s149_s22, 3 }
  0x2b   : > { %s150_s24 = scalar_lea.sflag (!%p144_p13), [#allocation3], %s149_s22  ;;  %s153_s25 = scalar_lea.vmem (!%p144_p13), [#allocation2], %s320_s23 }
  0x31   : > { %435 = dma.done.wait (%p521_p7), %s150_s24, 128  }
  0x32   : > { %437 = vsyncadd (%p521_p7), %s150_s24, 4294967168  ;;  %v185_v0 = vld [vmem:[%s153_s25] sm:$0xff]  ;;  %p177_p9 = scmp.lt.s32.totalorder %s452_s12, 1  ;;  %vm194_vm0 = vcmask 7168  }
  0x33   : > { %186 = vmin.xlane.f32.xlu0 %v185_v0 }
  0x34   : > { %s622_s12 = smov (!%p177_p9, %s452_s12), 1 }
  0x35   : > { %s321_s26 = sshll.u32 %s622_s12, 3 }
  0x36   : > { %s180_s29 = scalar_lea.vmem %s607_s1, %s321_s26  ;;  %s184_s20 = scalar_lea.vmem %s608_s2, %s321_s26 }
  0x37   : > { %188 = vmax.xlane.f32.xlu0 %v185_v0 }
  0xc0   : > { %v187_v1 = vpop.xlane.xlu0 %186 }
  0xc1   : > { %195 = vst.msk [vmem:[%s180_s29] sm:$0xff] %vm194_vm0, %v187_v1 }
  0xc4   : > { %v189_v2 = vpop.xlane.xlu0 %188 }
  0xc5   : > { %196 = vst.msk [vmem:[%s184_s20] sm:$0xff] %vm194_vm0, %v189_v2 }
  0xc6 PF: > { %s16_s14 = sadd.s32 1, %s460_s14   ;;  %s614_s9 = smov %s444_s10 }
  0xc7   : > { %p13_p7 = scmp.ge.s32.totalorder %s16_s14, 4   ;;  %s615_s10 = smov %s448_s11 }
  0xc8   : > { %s616_s11 = smov %s527_s21  ;;  %s617_s12 = smov %s456_s13 }
  0xc9   : > { %s618_s13 = smov %s620_s16  ;;  %15 = sbr.rel (!%p13_p7) target bundleno = 4 (0x4), region = 84 }
  0xd0   :  { %241 = vsyncpa [#allocation3], 1 }
  0xd1   :  { %243 = vsyncpa [#allocation3 + $0x1], 1 }

</bundles_post_ra>
